<compile_context>
chip_gen: v7x
topology: tpu7x:2x2x1
jax: 0.10.0
libtpu: 0.0.40
codegen_flags: <defaults>
</compile_context>

<pallas_src>
import functools

import jax
import jax.numpy as jnp
from jax.experimental import pallas as pl
from jax.experimental.pallas import tpu as pltpu

LANE = 128
SUBLANE = 8
VMEM_BUDGET = 24 * 1024 * 1024          # working-set target (fits all gens)
VMEM_LIMIT = 48 * 1024 * 1024           # scoped-VMEM limit passed to Mosaic


def _round_up(x, m):
    return (x + m - 1) // m * m


def _pick_tile(n_min, cap, align, max_waste_frac=0.125):
    """Largest tile t (multiple of `align`, <= cap) whose padding of `n_min`
    up to a multiple of t wastes at most `max_waste_frac` of the work."""
    cap = max(align, (min(cap, n_min) // align) * align)
    tol = max(0, int(n_min * max_waste_frac))
    t = cap
    while t >= align:
        if _round_up(n_min, t) - n_min <= tol:
            return t
        t -= align
    return align


def _vmem_bytes(tm, tk, d_in, d_pad):
    return (2 * tm * tk * 2        # A_hat tiles, bf16, double-buffered
            + 2 * tk * d_in * 2    # X tiles, bf16
            + 2 * d_in * d_pad * 2  # W (resident, constant index map)
            + 2 * tm * d_pad * 4    # output block (f32, resident accumulator)
            + 2 * d_pad * 4)        # bias


# ---------------------------------------------------------------------------
# Fused kernel:  out = log_softmax(A_hat @ (X @ W) + b)
#   grid = (row tiles, contraction tiles)
#   output block is the f32 accumulator (resident across the k axis);
#   bias add + masked log_softmax only on the last contraction step.
# ---------------------------------------------------------------------------
def _gcn_kernel(a_ref, x_ref, w_ref, b_ref, o_ref, *, d_out):
    k = pl.program_id(1)

    @pl.when(k == 0)
    def _():
        o_ref[...] = jnp.zeros_like(o_ref)

    # fused projection for this contraction slab (bf16 MXU, f32 accumulate)
    xw = jnp.dot(x_ref[...], w_ref[...], preferred_element_type=jnp.float32)
    o_ref[...] += jnp.dot(
        a_ref[...], xw.astype(jnp.bfloat16), preferred_element_type=jnp.float32
    )

    @pl.when(k == pl.num_programs(1) - 1)
    def _():
        h = o_ref[...] + b_ref[...]
        # mask padded class columns out of the softmax normalizer
        col = jax.lax.broadcasted_iota(jnp.int32, h.shape, 1)
        hm = jnp.where(col < d_out, h, jnp.float32(-1e30))
        m = jnp.max(hm, axis=-1, keepdims=True)
        s = hm - m                       # padded lanes: ~-1e30 -> exp == 0
        lse = jnp.log(jnp.sum(jnp.exp(s), axis=-1, keepdims=True))
        o_ref[...] = (s - lse).astype(o_ref.dtype)


def gcn_cls_forward(a_hat, x, w, b):
    n, d_in = x.shape
    d_out = w.shape[1]

    # lane-dense class axis
    d_pad = _round_up(d_out, LANE)

    # ---- tile / padding selection -----------------------------------------
    # contraction (neighbor) axis: multiple of 128, tk grown preferentially
    n_col_min = _round_up(n, LANE)
    tk = _pick_tile(n_col_min, 2048, LANE)
    n_col = _round_up(n_col_min, tk)

    # destination-row axis: multiple of 8; keep >= 2 row tiles when possible
    # so the "parallel" axis can shard across v7x's two TensorCores.
    n_row_min = _round_up(n, SUBLANE)
    tm_cap = 512
    if n_row_min >= 2 * SUBLANE:
        tm_cap = min(tm_cap, (n_row_min // 2) // SUBLANE * SUBLANE)
    tm = _pick_tile(n_row_min, tm_cap, SUBLANE)
    n_row = _round_up(n_row_min, tm)

    # keep the working set within budget (shrink tk first, then tm)
    while _vmem_bytes(tm, tk, d_in, d_pad) > VMEM_BUDGET and tk > LANE:
        tk = _pick_tile(n_col_min, tk - LANE, LANE)
        n_col = _round_up(n_col_min, tk)
    while _vmem_bytes(tm, tk, d_in, d_pad) > VMEM_BUDGET and tm > SUBLANE:
        tm = _pick_tile(n_row_min, tm - SUBLANE, SUBLANE)
        n_row = _round_up(n_row_min, tm)

    # ---- pad + cast once at the call boundary (bf16 MXU operands) ----------
    a_p = jnp.zeros((n_row, n_col), jnp.bfloat16).at[:n, :n].set(
        a_hat.astype(jnp.bfloat16))
    x_p = jnp.zeros((n_col, d_in), jnp.bfloat16).at[:n, :].set(
        x.astype(jnp.bfloat16))
    w_p = jnp.zeros((d_in, d_pad), jnp.bfloat16).at[:, :d_out].set(
        w.astype(jnp.bfloat16))
    b_p = jnp.zeros((1, d_pad), jnp.float32).at[0, :d_out].set(
        b.astype(jnp.float32))

    kernel = functools.partial(_gcn_kernel, d_out=d_out)
    out_p = pl.pallas_call(
        kernel,
        out_shape=jax.ShapeDtypeStruct((n_row, d_pad), jnp.float32),
        grid_spec=pltpu.PrefetchScalarGridSpec(
            num_scalar_prefetch=0,
            grid=(n_row // tm, n_col // tk),
            in_specs=[
                pl.BlockSpec((tm, tk), lambda i, k: (i, k)),       # A_hat tile
                pl.BlockSpec((tk, d_in), lambda i, k: (k, 0)),     # X slab
                pl.BlockSpec((d_in, d_pad), lambda i, k: (0, 0)),  # W (resident)
                pl.BlockSpec((1, d_pad), lambda i, k: (0, 0)),     # bias
            ],
            # output block index ignores k -> f32 accumulator resident in VMEM
            out_specs=pl.BlockSpec((tm, d_pad), lambda i, k: (i, 0)),
        ),
        compiler_params=pltpu.CompilerParams(
            dimension_semantics=("parallel", "arbitrary"),
            vmem_limit_bytes=VMEM_LIMIT,
        ),
    )(a_p, x_p, w_p, b_p)

    return out_p[:n, :d_out]


def build_normalized_adjacency(edge_index, num_nodes):
    """Dense equivalent of PyG gcn_norm (add self-loops, symmetric norm).

    edge_index: [2, E] int array, row 0 = source, row 1 = target.
    Duplicate edges scatter-add (multigraph-safe); self-loops are only added
    for nodes that do not already have one.
    """
    src, dst = edge_index[0], edge_index[1]
    a = jnp.zeros((num_nodes, num_nodes), jnp.float32)
    a = a.at[dst, src].add(1.0)
    diag = jnp.diagonal(a)
    a = a + jnp.diag(jnp.where(diag == 0.0, 1.0, 0.0))
    deg = jnp.sum(a, axis=1)
    dinv = jnp.where(deg > 0, 1.0 / jnp.sqrt(deg), 0.0)
    return dinv[:, None] * a * dinv[None, :]


if __name__ == "__main__":
    key = jax.random.PRNGKey(0)
    k_x, k_w, k_e = jax.random.split(key, 3)

    N = 16        # number of graph nodes
    D_IN = 32     # input feature dim
    D_OUT = 8     # number of classes
    E = 40        # number of directed edges

    x = jax.random.normal(k_x, (N, D_IN), jnp.float32)
    scale = jnp.sqrt(6.0 / (D_IN + D_OUT))
    w = jax.random.uniform(k_w, (D_IN, D_OUT), jnp.float32, -scale, scale)
    b = jnp.zeros((D_OUT,), jnp.float32)
    edge_index = jax.random.randint(k_e, (2, E), 0, N, dtype=jnp.int32)

    a_hat = build_normalized_adjacency(edge_index, N)

    out = gcn_cls_forward(a_hat, x, w, b)
    out = jax.block_until_ready(out)
    assert out.shape == (N, D_OUT)

    # Reference mirroring the kernel's bf16 MXU operand casts.
    xw = jnp.dot(x.astype(jnp.bfloat16), w.astype(jnp.bfloat16),
                 preferred_element_type=jnp.float32).astype(jnp.bfloat16)
    h = jnp.dot(a_hat.astype(jnp.bfloat16), xw,
                preferred_element_type=jnp.float32) + b[None, :]
    ref = h - jax.scipy.special.logsumexp(h, axis=1, keepdims=True)
    assert jnp.allclose(out, ref, atol=2e-2), "mismatch vs bf16-matched reference"

    # Loose sanity check against the pure-f32 math of the original module.
    h32 = a_hat @ (x @ w) + b[None, :]
    ref32 = h32 - jax.scipy.special.logsumexp(h32, axis=1, keepdims=True)
    assert jnp.allclose(out, ref32, atol=5e-2), "mismatch vs f32 reference"

    print("KERNEL_OK")
</pallas_src>

<mosaic_0001>
module attributes {stable_mosaic.version = 11 : i64} {
  func.func @_gcn_kernel(%arg0: i32, %arg1: i32, %arg2: memref<8x128xbf16, #tpu.memory_space<vmem>>, %arg3: memref<128x32xbf16, #tpu.memory_space<vmem>>, %arg4: memref<32x128xbf16, #tpu.memory_space<vmem>>, %arg5: memref<1x128xf32, #tpu.memory_space<vmem>>, %arg6: memref<8x128xf32, #tpu.memory_space<vmem>>) attributes {dimension_semantics = [#tpu.dimension_semantics<parallel>, #tpu.dimension_semantics<arbitrary>], iteration_bounds = array<i64: 2, 1>, scalar_prefetch = 0 : i64, scratch_operands = 0 : i64, tpu.core_type = #tpu.core_type<tc>, window_params = [{transform_indices = @transform_0, window_bounds = array<i64: 8, 128>}, {transform_indices = @transform_1, window_bounds = array<i64: 128, 32>}, {pipeline_mode = #tpu.pipeline_mode<synchronous>, transform_indices = @transform_2, window_bounds = array<i64: 32, 128>}, {pipeline_mode = #tpu.pipeline_mode<synchronous>, transform_indices = @transform_3, window_bounds = array<i64: 1, 128>}, {transform_indices = @transform_4, window_bounds = array<i64: 8, 128>}]} {
    %c0_i32 = arith.constant 0 : i32
    %0 = arith.cmpi eq, %arg1, %c0_i32 : i32
    %1 = arith.extui %0 : i1 to i32
    %c0_i32_0 = arith.constant 0 : i32
    %2 = arith.cmpi ne, %1, %c0_i32_0 : i32
    scf.if %2 {
      %cst_13 = arith.constant 0.000000e+00 : f32
      %15 = vector.broadcast %cst_13 : f32 to vector<8x128xf32>
      %c0_14 = arith.constant 0 : index
      %c0_15 = arith.constant 0 : index
      %16 = vector.load %arg6[%c0_14, %c0_15] : memref<8x128xf32, #tpu.memory_space<vmem>>, vector<8x128xf32>
      tpu.vector_store %arg6[%c0_14, %c0_15], %15 {strides = array<i32>} : memref<8x128xf32, #tpu.memory_space<vmem>>, vector<8x128xf32>,
    } else {
    }
    %c0 = arith.constant 0 : index
    %c0_1 = arith.constant 0 : index
    %3 = vector.load %arg3[%c0, %c0_1] : memref<128x32xbf16, #tpu.memory_space<vmem>>, vector<128x32xbf16>
    %c0_2 = arith.constant 0 : index
    %c0_3 = arith.constant 0 : index
    %4 = vector.load %arg4[%c0_2, %c0_3] : memref<32x128xbf16, #tpu.memory_space<vmem>>, vector<32x128xbf16>
    %cst = arith.constant dense<0.000000e+00> : vector<128x128xf32>
    %5 = tpu.matmul %3, %4, %cst {dimension_numbers = #tpu.dot_dimension_numbers<[1], [0], [0], [1], [0, 0, 1, 1], [], []>} : vector<128x32xbf16>, vector<32x128xbf16>, vector<128x128xf32> -> vector<128x128xf32>
    %c0_4 = arith.constant 0 : index
    %c0_5 = arith.constant 0 : index
    %6 = vector.load %arg6[%c0_4, %c0_5] : memref<8x128xf32, #tpu.memory_space<vmem>>, vector<8x128xf32>
    %c0_6 = arith.constant 0 : index
    %c0_7 = arith.constant 0 : index
    %7 = vector.load %arg2[%c0_6, %c0_7] : memref<8x128xbf16, #tpu.memory_space<vmem>>, vector<8x128xbf16>
    %8 = arith.truncf %5 : vector<128x128xf32> to vector<128x128xbf16>
    %cst_8 = arith.constant dense<0.000000e+00> : vector<8x128xf32>
    %9 = tpu.matmul %7, %8, %cst_8 {dimension_numbers = #tpu.dot_dimension_numbers<[1], [0], [0], [1], [0, 0, 1, 1], [], []>} : vector<8x128xbf16>, vector<128x128xbf16>, vector<8x128xf32> -> vector<8x128xf32>
    %10 = arith.addf %6, %9 : vector<8x128xf32>
    %c0_9 = arith.constant 0 : index
    %c0_10 = arith.constant 0 : index
    %11 = vector.load %arg6[%c0_9, %c0_10] : memref<8x128xf32, #tpu.memory_space<vmem>>, vector<8x128xf32>
    tpu.vector_store %arg6[%c0_9, %c0_10], %10 {strides = array<i32>} : memref<8x128xf32, #tpu.memory_space<vmem>>, vector<8x128xf32>,
    %c0_i32_11 = arith.constant 0 : i32
    %12 = arith.cmpi eq, %arg1, %c0_i32_11 : i32
    %13 = arith.extui %12 : i1 to i32
    %c0_i32_12 = arith.constant 0 : i32
    %14 = arith.cmpi ne, %13, %c0_i32_12 : i32
    scf.if %14 {
      %c0_13 = arith.constant 0 : index
      %c0_14 = arith.constant 0 : index
      %15 = vector.load %arg6[%c0_13, %c0_14] : memref<8x128xf32, #tpu.memory_space<vmem>>, vector<8x128xf32>
      %c0_15 = arith.constant 0 : index
      %c0_16 = arith.constant 0 : index
      %16 = vector.load %arg5[%c0_15, %c0_16] : memref<1x128xf32, #tpu.memory_space<vmem>>, vector<1x128xf32>
      %17 = vector.broadcast %16 : vector<1x128xf32> to vector<8x128xf32>
      %18 = arith.addf %15, %17 : vector<8x128xf32>
      %19 = tpu.iota {dimensions = array<i32: 1>} : vector<8x128xi32>
      %c8_i32 = arith.constant 8 : i32
      %20 = vector.broadcast %c8_i32 : i32 to vector<8x128xi32>
      %21 = arith.cmpi slt, %19, %20 : vector<8x128xi32>
      %cst_17 = arith.constant -1.000000e+30 : f32
      %22 = vector.broadcast %cst_17 : f32 to vector<8x128xf32>
      %23 = arith.select %21, %18, %22 : vector<8x128xi1>, vector<8x128xf32>
      %cst_18 = arith.constant dense<0xFF800000> : vector<8xf32>
      %24 = vector.multi_reduction <maximumf>, %23, %cst_18 [1] : vector<8x128xf32> to vector<8xf32>
      %25 = vector.shape_cast %24 : vector<8xf32> to vector<8x1xf32>
      %26 = vector.broadcast %25 : vector<8x1xf32> to vector<8x128xf32>
      %27 = arith.subf %23, %26 : vector<8x128xf32>
      %28 = math.exp %27 : vector<8x128xf32>
      %cst_19 = arith.constant dense<0.000000e+00> : vector<8xf32>
      %29 = vector.multi_reduction <add>, %28, %cst_19 [1] : vector<8x128xf32> to vector<8xf32>
      %30 = vector.shape_cast %29 : vector<8xf32> to vector<8x1xf32>
      %31 = math.log %30 : vector<8x1xf32>
      %32 = vector.broadcast %31 : vector<8x1xf32> to vector<8x128xf32>
      %33 = arith.subf %27, %32 : vector<8x128xf32>
      %c0_20 = arith.constant 0 : index
      %c0_21 = arith.constant 0 : index
      %34 = vector.load %arg6[%c0_20, %c0_21] : memref<8x128xf32, #tpu.memory_space<vmem>>, vector<8x128xf32>
      tpu.vector_store %arg6[%c0_20, %c0_21], %33 {strides = array<i32>} : memref<8x128xf32, #tpu.memory_space<vmem>>, vector<8x128xf32>,
    } else {
    }
    return
  }
  func.func @transform_0(%arg0: i32, %arg1: i32) -> (i32, i32) {
    %c0_i32 = arith.constant 0 : i32
    return %arg0, %arg1 : i32, i32
  }
  func.func @transform_1(%arg0: i32, %arg1: i32) -> (i32, i32) {
    %c0_i32 = arith.constant 0 : i32
    %c0_i32_0 = arith.constant 0 : i32
    return %arg1, %c0_i32 : i32, i32
  }
  func.func @transform_2(%arg0: i32, %arg1: i32) -> (i32, i32) {
    %c0_i32 = arith.constant 0 : i32
    %c0_i32_0 = arith.constant 0 : i32
    %c0_i32_1 = arith.constant 0 : i32
    return %c0_i32, %c0_i32_0 : i32, i32
  }
  func.func @transform_3(%arg0: i32, %arg1: i32) -> (i32, i32) {
    %c0_i32 = arith.constant 0 : i32
    %c0_i32_0 = arith.constant 0 : i32
    %c0_i32_1 = arith.constant 0 : i32
    return %c0_i32, %c0_i32_0 : i32, i32
  }
  func.func @transform_4(%arg0: i32, %arg1: i32) -> (i32, i32) {
    %c0_i32 = arith.constant 0 : i32
    %c0_i32_0 = arith.constant 0 : i32
    return %arg0, %c0_i32 : i32, i32
  }
}

</mosaic_0001>

<bundles_post_ra>
// kernel: tpu_custom_call.1
= control target key start
LH: loop header
LB: loop body
LE: loop exit
PB: predicated region body
PF: predicated region fallthrough
CT: control target
= control target key end

     0   :  { %9 = vsyncpa [#allocation3], 0  ;;  %s1038_s0 = inlined_call_operand.vmem [shape: bf16[16,128], index: 0, kind: input, shape index: {}]   ;;  %s1039_s1 = inlined_call_operand.vmem [shape: bf16[128,32], index: 1, kind: input, shape index: {}]   ;;  %s1040_s2 = inlined_call_operand.vmem [shape: bf16[32,128], index: 2, kind: input, shape index: {}]   ;;  %s1041_s3 = inlined_call_operand.vmem [shape: f32[1,128], index: 3, kind: input, shape index: {}]   ;;  %s1042_s4 = inlined_call_operand.hbm [shape: f32[16,128], index: 4, kind: output, shape index: {}]  }
   0x1   :  { %11 = vsyncpa [#allocation3 + $0x1], 0  ;;  %s885_s15 = smov 0   ;;  %s887_s16 = smov 0  }
   0x2   :  { %s889_s17 = smov 0   ;;  %s891_s18 = smov 0  }
   0x3   :  { %s893_s19 = smov 0   ;;  %s895_s20 = smov 0  }
   0x4 LB: > { %s616_s21 = sadd.s32 4294967295, %s855_s20   ;;  %s617_s22 = sadd.s32 4294967294, %s855_s20   ;;  %s855_s20 = sphi %s895_s20, %s17_s20   ;;  %s851_s19 = sphi %s893_s19, %s1049_s19   ;;  %s847_s18 = sphi %s891_s18, %s1048_s18   ;;  %s843_s17 = sphi %s889_s17, %s1047_s17   ;;  %s839_s16 = sphi %s887_s16, %s1046_s16   ;;  %s835_s15 = sphi %s885_s15, %s1045_s15  }
   0x5   : > { %s29_s23 = sadd.s32 1, %s851_s19  ;;  %s132_s24 = sadd.s32 1, %s843_s17 }
   0x6   : > { %p31_p0 = scmp.ge.s32.totalorder %s29_s23, 2  ;;  %p142_p1 = scmp.ne.s32.totalorder %s843_s17, %s839_s16 }
   0x7   : > { %p143_p2 = scmp.eq.s32.totalorder %s616_s21, 1  ;;  %p148_p3 = scmp.ne.s32.totalorder %s839_s16, %s835_s15 }
   0x8   : > { %s1051_s23 = smov (%p31_p0, %s29_s23), 0  ;;  %p149_p5 = scmp.eq.s32.totalorder %s617_s22, 1 }
   0x9   : > { %p925_p4 = por %p143_p2, %p142_p1  ;;  %s129_s26 = ssub.s32 %s851_s19, %s1051_s23 }
   0xa   : > { %p621_p6 = scmp.ge.s32.totalorder %s855_s20, 1  ;;  %p130_p7 = scmp.eq.s32.totalorder %s129_s26, 0 }
   0xb   : > { %p932_p8 = por %p149_p5, %p148_p3  ;;  %p192_p9 = scmp.lt.s32.totalorder %s855_s20, 3 }
   0xc   : > { %s938_s28 = scalar_select %p130_p7, %s843_s17, %s132_s24  }
   0xd   : > { %p193_p10 = pnand %p621_p6, %p192_p9 }
   0xe   : > { %v763_v0 = vld [vmem:[%s1040_s2] sm:$0xff] (!%p193_p10)   ;;  %v764_v1 = vld [vmem:[%s1040_s2 + $0x8] sm:$0xff] (!%p193_p10)   ;;  %vm316_vm0 = vcmask (!%p193_p10), 261120   ;;  %v767_v4 = vld [vmem:[%s1039_s1 + $0x10] sm:$0xff] (!%p193_p10)   ;;  %v857_v10 = vmov (!%p193_p10), 0.0   ;;  %vm858_vm1 = vmmov (!%p193_p10), 0   ;;  %v502_v36 = vlaneseq (!%p193_p10) }
   0xf   : > { %196 = sbr.rel (%p193_p10) target bundleno = 814 (0x32e), region = 36  ;;  %666 = vmatprep.subr.bf16.mxu0 (!%p193_p10), %v763_v0  ;;  %v765_v2 = vld [vmem:[%s1039_s1] sm:$0xff] (!%p193_p10)   ;;  %v766_v3 = vld [vmem:[%s1039_s1 + $0x8] sm:$0xff] (!%p193_p10)   ;;  %v768_v5 = vld [vmem:[%s1039_s1 + $0x18] sm:$0xff] (!%p193_p10)   ;;  %686 = vmatprep.subr.bf16.mxu1 (!%p193_p10), %v857_v10  ;;  %p225_p11 = scmp.lt.s32.totalorder (!%p193_p10), %s847_s18, 1 }
  0x10   : > { %667 = vmatpush3.bf16.msra.mxu0 (!%p193_p10), %v763_v0  ;;  %670 = vmatprep.mubr.msk.bf16.mxu0 (!%p193_p10), %vm316_vm0, %v765_v2  ;;  %v769_v6 = vld [vmem:[%s1039_s1 + $0x20] sm:$0xff] (!%p193_p10)   ;;  %v770_v7 = vld [vmem:[%s1039_s1 + $0x28] sm:$0xff] (!%p193_p10)   ;;  %v771_v8 = vld [vmem:[%s1039_s1 + $0x30] sm:$0xff] (!%p193_p10)   ;;  %v503_v37 = vand.u32 (!%p193_p10), 127, %v502_v36  ;;  %s222_s14 = sand.u32 (!%p193_p10), 1, %s839_s16   ;;  %s644_s22 = sshll.u32 (!%p193_p10), %s847_s18, 7 }
  0x11   : > { %668 = vmatprep.subr.bf16.mxu0 (!%p193_p10), %v764_v1  ;;  %v772_v9 = vld [vmem:[%s1039_s1 + $0x38] sm:$0xff] (!%p193_p10)   ;;  %702 = vmatprep.mubr.msk.bf16.mxu1 (!%p193_p10), %vm858_vm1, %v857_v10  ;;  %v642_v39 = vld [vmem:[%s1041_s3] ss:$0 sm:$0xff] (!%p193_p10)  ;;  %s622_s21 = sshll.u32 (!%p193_p10), %s222_s14, 3  ;;  %s991_s5 = scalar_lea.hbm (!%p193_p10), %s1042_s4, %s644_s22 }
  0x12   : > { %vm504_vm2 = vcmp.lt.s32.totalorder (!%p193_p10), %v503_v37, 8  ;;  %s224_s24 = scalar_lea.vmem (!%p193_p10), [#allocation2], %s622_s21  ;;  %s518_s6 = scalar_lea.sflag (!%p193_p10), [#allocation3], %s222_s14 }
  0x13   : > { %s531_s26 = sshll.u32 (!%p193_p10), %s224_s24, 4  ;;  %s993_s26 = int_to_ptr.vmem [resolvable:$true] %s531_s26 }
  0x14   : > { %669 = vmatpush3.bf16.msra.mxu0 (!%p193_p10), %v764_v1 }
  0x16   : > { %s226_s7 = scalar_select %p225_p11, %s847_s18, 1 }
  0x17   : > { %671 = vmatmul.mubr.msk.bf16.vlgmr.msra.gmra.mrb[0].mxu0 %vm316_vm0, %v766_v3  ;;  %s859_s18 = smov [#allocation2]  }
  0x18   : > { %674 = vmatprep.mubr.msk.bf16.mxu0 %vm316_vm0, %v767_v4  ;;  %s623_s8 = sshll.u32 %s226_s7, 2  ;;  %s777_s7 = scalar_lea.vmem %s993_s26, 128 }
  0x19   : > { %s231_s11 = scalar_lea.vmem %s1038_s0, %s623_s8  ;;  %p778_p12 = scmp.ne.s32.totalorder %s993_s26, %s777_s7 }
  0x1a   : > { %v439_v35 = vld [vmem:[%s231_s11] sm:$0xf]  ;;  %s781_s8 = sshll.u32 %s859_s18, 4  ;;  %s782_s8 = int_to_ptr.vmem [resolvable:$false] %s781_s8 }
  0x1b   : > { %p779_p13 = pnand %p778_p12, %p925_p4  ;;  %s783_s9 = scalar_lea.vmem %s782_s8, 256 }
  0x1c   : > { %p784_p1 = scmp.lt.s32.totalorder %s993_s26, %s782_s8  ;;  %p785_p2 = scmp.lt.s32.totalorder %s783_s9, %s777_s7 }
  0x1d   : > { %p780_p0 = pneg %p779_p13 }
  0x1e   : > { %p786_p3 = por %p785_p2, %p784_p1 }
  0x1f   : > { %675 = vmatmul.mubr.msk.bf16.gmra.mrb[4].mxu0 %vm316_vm0, %v768_v5 }
  0x20   : > { %678 = vmatprep.mubr.msk.bf16.mxu0 %vm316_vm0, %v769_v6  ;;  %p787_p5 = pnand %p786_p3, %p780_p0 }
  0x27   : > { %679 = vmatmul.mubr.msk.bf16.gmra.mrb[8].mxu0 %vm316_vm0, %v770_v7 }
  0x28   : > { %682 = vmatprep.mubr.msk.bf16.mxu0 %vm316_vm0, %v771_v8 }
  0x2f   : > { %683 = vmatmul.mubr.msk.bf16.gmra.mrb[12].mxu0 %vm316_vm0, %v772_v9 }
  0xea   : > { %v672_v11 = vpop.f32.mrb[0].mxu0 }
  0xeb   : > { %v375_v12 = vpop.f32.mrb[1].mxu0 }
  0xec   : > { %v673_v13 = vpop.f32.mrb[2].mxu0 }
  0xed   : > { %v441_v14 = vpack.c.bf16 %v673_v13, %v672_v11  ;;  %v378_v15 = vpop.f32.mrb[3].mxu0 }
  0xee   : > { %v440_v16 = vpack.c.bf16 %v378_v15, %v375_v12 }
  0xf0   : > { %687 = vmatpush3.bf16.msra.mxu1 %v440_v16 }
  0xf1   : > { %688 = vmatprep.subr.bf16.mxu1 %v857_v10 }
  0xf2   : > { %v676_v17 = vpop.f32.mrb[4].mxu0 }
  0xf3   : > { %v391_v18 = vpop.f32.mrb[5].mxu0 }
  0xf4   : > { %v677_v19 = vpop.f32.mrb[6].mxu0  ;;  %689 = vmatpush3.bf16.msra.mxu1 %v441_v14 }
  0xf5   : > { %v443_v20 = vpack.c.bf16 %v677_v19, %v676_v17  ;;  %v394_v21 = vpop.f32.mrb[7].mxu0  ;;  %690 = vmatprep.subr.bf16.mxu1 %v857_v10 }
  0xf6   : > { %v442_v22 = vpack.c.bf16 %v394_v21, %v391_v18 }
  0xf8   : > { %691 = vmatpush3.bf16.msra.mxu1 %v442_v22 }
  0xf9   : > { %692 = vmatprep.subr.bf16.mxu1 %v857_v10 }
  0xfa   : > { %v680_v23 = vpop.f32.mrb[8].mxu0 }
  0xfb   : > { %v407_v24 = vpop.f32.mrb[9].mxu0 }
  0xfc   : > { %v681_v25 = vpop.f32.mrb[10].mxu0  ;;  %693 = vmatpush3.bf16.msra.mxu1 %v443_v20 }
  0xfd   : > { %v445_v26 = vpack.c.bf16 %v681_v25, %v680_v23  ;;  %v410_v27 = vpop.f32.mrb[11].mxu0  ;;  %694 = vmatprep.subr.bf16.mxu1 %v857_v10 }
  0xfe   : > { %v444_v28 = vpack.c.bf16 %v410_v27, %v407_v24 }
 0x100   : > { %695 = vmatpush3.bf16.msra.mxu1 %v444_v28 }
 0x101   : > { %696 = vmatprep.subr.bf16.mxu1 %v857_v10 }
 0x102   : > { %v684_v29 = vpop.f32.mrb[12].mxu0 }
 0x103   : > { %v423_v30 = vpop.f32.mrb[13].mxu0 }
 0x104   : > { %v685_v31 = vpop.f32.mrb[14].mxu0  ;;  %697 = vmatpush3.bf16.msra.mxu1 %v445_v26 }
 0x105   : > { %v447_v32 = vpack.c.bf16 %v685_v31, %v684_v29  ;;  %v426_v33 = vpop.f32.mrb[15].mxu0  ;;  %698 = vmatprep.subr.bf16.mxu1 %v857_v10 }
 0x106   : > { %v446_v34 = vpack.c.bf16 %v426_v33, %v423_v30 }
 0x108   : > { %699 = vmatpush3.bf16.msra.mxu1 %v446_v34 }
 0x109   : > { %700 = vmatprep.subr.bf16.mxu1 %v857_v10 }
 0x10c   : > { %701 = vmatpush3.bf16.msra.mxu1 %v447_v32 }
 0x10f   : > { %703 = vmatmul.mubr.bf16.vlgmr.msra.gmra.mrb[0].mxu1 %v439_v35 }
 0x1e2   : > { %v482_v38 = vpop.f32.mrb[0].mxu1 }
 0x1e3   : > { %v704_v40 = vpop.f32.mrb[1].mxu1  ;;  %v501_v43 = vadd.f32 %v642_v39, %v482_v38 }
 0x1e4   : > { %v485_v41 = vpop.f32.mrb[2].mxu1 }
 0x1e5   : > { %v705_v42 = vpop.f32.mrb[3].mxu1  ;;  %v505_v44 = vsel %vm504_vm2, %v501_v43, -1e+30 }
 0x1e6   : > { %506 = vmax.xlane.f32.xlu0 %v505_v44 }
 0x273   : > { %v507_v45 = vpop.xlane.xlu0 %506 }
 0x274   : > { %v508_v46 = vsub.f32 %v505_v44, %v507_v45 }
 0x276   : > { %v509_v47 = vmul.f32 1.442695, %v508_v46 }
 0x278   : > { %773 = vpow2.f32 %v509_v47 }
 0x282   : > { %v774_v48 = vpop.eup %773 }
 0x283   : > { %511 = vadd.xlane.f32.xlu0 %v774_v48 }
 0x310   : > { %v512_v49 = vpop.xlane.xlu0 %511 }
 0x311   : > { %775 = vlog2.f32 %v512_v49 }
 0x31b   : > { %v776_v50 = vpop.eup %775 }
 0x31c   : > { %v514_v51 = vmul.f32 0.6931472, %v776_v50 }
 0x31e   : > { %v515_v52 = vsub.f32 %v508_v46, %v514_v51 }
 0x320   : > { %516 = vst [vmem:[%s224_s24] sm:$0xff] %v515_v52 }
 0x321   : > { %790 = shalt.err (!%p787_p5)
}
 0x322   : > { %s791_s10 = scalar_lea.hbm %s991_s5, 128  ;;  %s795_s13 = scalar_lea.hbm %s1042_s4, 256 }
 0x323   : > { %p792_p6 = scmp.ne.s32.totalorder %s991_s5, %s791_s10  ;;  %p796_p10 = scmp.lt.u32.totalorder %s991_s5, %s1042_s4 }
 0x324   : > { %p797_p11 = scmp.lt.u32.totalorder %s795_s13, %s791_s10  ;;  %p799_p13 = scmp.lt.u32.totalorder %s791_s10, %s991_s5 }
 0x325   : > { %p793_p7 = pnand %p792_p6, %p925_p4 }
 0x326   : > { %p798_p12 = por %p797_p11, %p796_p10 }
 0x327   : > { %p794_p9 = pneg %p793_p7 }
 0x328   : > { %p800_p0 = por %p799_p13, %p798_p12 }
 0x32a   : > { %p801_p1 = pnand %p800_p0, %p794_p9 }
 0x32c   : > { %804 = shalt.err (!%p801_p1)
}
 0x32d   : > { %706 = dma.vmem_to_hbm [thread:$0]  (%p925_p4), %s993_s26, 128, %s991_s5, %s518_s6  }
 0x32e PF: > { %p712_p2 = scmp.ge.s32.totalorder %s855_s20, 2  ;;  %s543_s22 = sand.u32 1, %s835_s15  }
 0x32f   : > { %s544_s24 = scalar_lea.sflag [#allocation3], %s543_s22 }
 0x330   : > { %p709_p3 = pnand %p712_p2, %p932_p8 }
 0x332   : > { %830 = dma.done.wait (!%p709_p3), %s544_s24, 128  }
 0x333   : > { %832 = vsyncadd (!%p709_p3), %s544_s24, 4294967168  ;;  %s17_s20 = sadd.s32 1, %s855_s20   ;;  %s1045_s15 = smov %s839_s16 }
 0x334   : > { %p14_p5 = scmp.ge.s32.totalorder %s17_s20, 4   ;;  %s1046_s16 = smov %s843_s17 }
 0x335   : > { %s1047_s17 = smov %s938_s28  ;;  %s1048_s18 = smov %s851_s19 }
 0x336   : > { %s1049_s19 = smov %s1051_s23  ;;  %16 = sbr.rel (!%p14_p5) target bundleno = 4 (0x4), region = 82 }
 0x33d   :  { %549 = vsyncpa [#allocation3], 1 }
 0x33e   :  { %551 = vsyncpa [#allocation3 + $0x1], 1 }

</bundles_post_ra>
